<compile_context>
chip_gen: v7x
topology: tpu7x:2x2x1
jax: 0.10.0
libtpu: 0.0.40
codegen_flags: <defaults>
</compile_context>

<pallas_src>
import jax
import jax.numpy as jnp
from jax.experimental import pallas as pl
from jax.experimental.pallas import tpu as pltpu


def _mm_cat_kernel(x1_ref, x2_ref, o_ref):
    # One matmul on the MXU, f32 accumulation (matches torch.mm numerics).
    mm = jnp.dot(x1_ref[...], x2_ref[...], preferred_element_type=jnp.float32)
    mm = mm.astype(o_ref.dtype)
    m = mm.shape[0]
    # Direct, statically-unrolled slice stores replace the 4-way concatenate:
    # the same vreg tile is written to four row offsets of the output, avoiding
    # the (16,4) intermediate and the sublane relayout it implied.
    for i in range(4):
        o_ref[pl.ds(i * m, m), :] = mm


def model_forward(x1: jax.Array, x2: jax.Array) -> jax.Array:
    m, k = x1.shape
    k2, n = x2.shape
    assert k == k2
    return pl.pallas_call(
        _mm_cat_kernel,
        out_shape=jax.ShapeDtypeStruct((4 * m, n), jnp.float32),
        in_specs=[
            pl.BlockSpec(memory_space=pltpu.VMEM),
            pl.BlockSpec(memory_space=pltpu.VMEM),
        ],
        out_specs=pl.BlockSpec(memory_space=pltpu.VMEM),
    )(x1, x2)


if __name__ == "__main__":
    key = jax.random.PRNGKey(0)
    k1, k2 = jax.random.split(key)
    x1 = jax.random.normal(k1, (4, 4), dtype=jnp.float32)
    x2 = jax.random.normal(k2, (4, 4), dtype=jnp.float32)

    out = model_forward(x1, x2)
    jax.block_until_ready(out)

    # Reference check against plain JAX (same semantics as torch.mm + cat).
    ref = jnp.concatenate([x1 @ x2] * 4, axis=0)
    assert out.shape == (16, 4), out.shape
    assert jnp.allclose(out, ref, atol=1e-5, rtol=1e-5), "mismatch vs reference"

    print("KERNEL_OK")
</pallas_src>

<mosaic_0001>
module attributes {stable_mosaic.version = 11 : i64} {
  func.func @_mm_cat_kernel(%arg0: memref<4x4xf32, #tpu.memory_space<vmem>>, %arg1: memref<4x4xf32, #tpu.memory_space<vmem>>, %arg2: memref<16x4xf32, #tpu.memory_space<vmem>>) attributes {dimension_semantics = [], scalar_prefetch = 0 : i64, scratch_operands = 0 : i64, tpu.core_type = #tpu.core_type<tc>} {
    %c0 = arith.constant 0 : index
    %c0_0 = arith.constant 0 : index
    %0 = vector.load %arg0[%c0, %c0_0] : memref<4x4xf32, #tpu.memory_space<vmem>>, vector<4x4xf32>
    %c0_1 = arith.constant 0 : index
    %c0_2 = arith.constant 0 : index
    %1 = vector.load %arg1[%c0_1, %c0_2] : memref<4x4xf32, #tpu.memory_space<vmem>>, vector<4x4xf32>
    %cst = arith.constant dense<0.000000e+00> : vector<4x4xf32>
    %2 = tpu.matmul %0, %1, %cst {dimension_numbers = #tpu.dot_dimension_numbers<[1], [0], [0], [1], [0, 0, 1, 1], [], []>} : vector<4x4xf32>, vector<4x4xf32>, vector<4x4xf32> -> vector<4x4xf32>
    %c0_3 = arith.constant 0 : index
    %c0_4 = arith.constant 0 : index
    %3 = vector.load %arg2[%c0_3, %c0_4] : memref<16x4xf32, #tpu.memory_space<vmem>>, vector<4x4xf32>
    tpu.vector_store %arg2[%c0_3, %c0_4], %2 {strides = array<i32>} : memref<16x4xf32, #tpu.memory_space<vmem>>, vector<4x4xf32>,
    %c4 = arith.constant 4 : index
    %c0_5 = arith.constant 0 : index
    %4 = vector.load %arg2[%c4, %c0_5] : memref<16x4xf32, #tpu.memory_space<vmem>>, vector<4x4xf32>
    tpu.vector_store %arg2[%c4, %c0_5], %2 {strides = array<i32>} : memref<16x4xf32, #tpu.memory_space<vmem>>, vector<4x4xf32>,
    %c8 = arith.constant 8 : index
    %c0_6 = arith.constant 0 : index
    %5 = vector.load %arg2[%c8, %c0_6] : memref<16x4xf32, #tpu.memory_space<vmem>>, vector<4x4xf32>
    tpu.vector_store %arg2[%c8, %c0_6], %2 {strides = array<i32>} : memref<16x4xf32, #tpu.memory_space<vmem>>, vector<4x4xf32>,
    %c12 = arith.constant 12 : index
    %c0_7 = arith.constant 0 : index
    %6 = vector.load %arg2[%c12, %c0_7] : memref<16x4xf32, #tpu.memory_space<vmem>>, vector<4x4xf32>
    tpu.vector_store %arg2[%c12, %c0_7], %2 {strides = array<i32>} : memref<16x4xf32, #tpu.memory_space<vmem>>, vector<4x4xf32>,
    return
  }
}

</mosaic_0001>

<bundles_post_ra>
// kernel: tpu_custom_call.1
= control target key start
LH: loop header
LB: loop body
LE: loop exit
PB: predicated region body
PF: predicated region fallthrough
CT: control target
= control target key end

     0   :  { %7 = vsyncpa [#allocation3], 0  ;;  %s242_s0 = inlined_call_operand.hbm [shape: f32[4,4], index: 0, kind: input, shape index: {}]   ;;  %s243_s1 = inlined_call_operand.hbm [shape: f32[4,4], index: 1, kind: input, shape index: {}]   ;;  %s244_s2 = inlined_call_operand.vmem [shape: f32[16,4], index: 2, kind: output, shape index: {}]  }
   0x1   :  { %8 = vsyncpa [#allocation5], 0  ;;  %s187_s9 = smov [#allocation2]   ;;  %s188_s11 = smov [#allocation4]  }
   0x2   :  { %s15_s10 = sshll.u32 %s187_s9, 4  ;;  %s25_s12 = sshll.u32 %s188_s11, 4  ;;  %s16_s10 = int_to_ptr.vmem [resolvable:$true] %s15_s10  ;;  %s26_s12 = int_to_ptr.vmem [resolvable:$true] %s25_s12 }
   0x3   :  { %s139_s15 = scalar_lea.hbm %s242_s0, 64 }
   0x4   :  { %p140_p0 = scmp.ne.s32.totalorder %s242_s0, %s139_s15  ;;  %p143_p1 = scmp.lt.u32.totalorder %s139_s15, %s242_s0 }
   0x6   :  { %p145_p2 = pnand %p143_p1, %p140_p0 }
   0x8   :  { %148 = shalt.err (!%p145_p2)
}
   0x9   :  { %s149_s20 = scalar_lea.vmem %s16_s10, 64  ;;  %p154_p4 = scmp.lt.s32.totalorder %s16_s10, %s16_s10 }
   0xa   :  { %p150_p3 = scmp.ne.s32.totalorder %s16_s10, %s149_s20  ;;  %p155_p5 = scmp.lt.s32.totalorder %s149_s20, %s149_s20 }
   0xc   :  { %p156_p6 = por %p155_p5, %p154_p4 }
   0xe   :  { %p157_p7 = pnand %p156_p6, %p150_p3 }
  0x10   :  { %160 = shalt.err (!%p157_p7)
}
  0x11   :  { %18 = dma.hbm_to_vmem [thread:$0]  %s242_s0, 64, %s16_s10, [#allocation3]  }
  0x12   :  { %s161_s25 = scalar_lea.hbm %s243_s1, 64 }
  0x13   :  { %p162_p8 = scmp.ne.s32.totalorder %s243_s1, %s161_s25  ;;  %p165_p9 = scmp.lt.u32.totalorder %s161_s25, %s243_s1 }
  0x15   :  { %p167_p10 = pnand %p165_p9, %p162_p8 }
  0x17   :  { %170 = shalt.err (!%p167_p10)
}
  0x18   :  { %s171_s30 = scalar_lea.vmem %s26_s12, 64  ;;  %p176_p12 = scmp.lt.s32.totalorder %s26_s12, %s26_s12 }
  0x19   :  { %p172_p11 = scmp.ne.s32.totalorder %s26_s12, %s171_s30  ;;  %p177_p13 = scmp.lt.s32.totalorder %s171_s30, %s171_s30 }
  0x1b   :  { %p178_p0 = por %p177_p13, %p176_p12 }
  0x1d   :  { %p179_p1 = pnand %p178_p0, %p172_p11 }
  0x1f   :  { %182 = shalt.err (!%p179_p1)
}
  0x20   :  { %28 = dma.hbm_to_vmem [thread:$0]  %s243_s1, 64, %s26_s12, [#allocation5]  }
  0x21   :  { %183 = dma.done.wait [#allocation3], 64  }
  0x22   :  { %184 = vsyncadd [#allocation3], 4294967232 }
  0x23   :  { %185 = dma.done.wait [#allocation5], 64  }
  0x24   :  { %186 = vsyncadd [#allocation5], 4294967232  ;;  %v189_v0 = vmov 0.0   ;;  %vm190_vm0 = vmmov 0   ;;  %vm41_vm1 = vcmask 1043456   ;;  %vm37_vm2 = vcmask 31744  }
  0x25   :  { %130 = vmatprep.subr.mxu0 %v189_v0  ;;  %132 = vmatprep.mubr.msk.f32.mxu0 %vm190_vm0, %v189_v0  ;;  %v36_v1 = vld [vmem:[#allocation4] sm:$0xf]  ;;  %v35_v2 = vld [vmem:[#allocation2] sm:$0xf]  ;;  %vm115_vm3 = vcmask 27648  }
  0x26   :  { %131 = vmatpush3.msk.msra.mxu0 %vm41_vm1, %v36_v1 }
  0x27   :  { %133 = vmatmul.mubr.msk.f32.vlgmr.msra.gmra.mrb[0].mxu0 %vm37_vm2, %v35_v2 }
  0xfa   :  { %v111_v3 = vpop.f32.mrb[0].mxu0 }
  0xfb   :  { %116 = vst.msk [vmem:[%s244_s2] sm:$0xf] %vm115_vm3, %v111_v3  ;;  %117 = vst.msk [vmem:[%s244_s2 + $0x4] sm:$0xf] %vm115_vm3, %v111_v3  ;;  %v134_v4 = vpop.f32.mrb[1].mxu0 }
  0xfc   :  { %118 = vst.msk [vmem:[%s244_s2 + $0x8] sm:$0xf] %vm115_vm3, %v111_v3  ;;  %119 = vst.msk [vmem:[%s244_s2 + $0xc] sm:$0xf] %vm115_vm3, %v111_v3 }
  0xfd   :  { %124 = vsyncpa [#allocation3], 1 }
  0xfe   :  { %125 = vsyncpa [#allocation5], 1 }

</bundles_post_ra>
